<compile_context>
chip_gen: v7x
topology: tpu7x:2x2x1
jax: 0.10.0
libtpu: 0.0.40
codegen_flags: <defaults>
</compile_context>

<pallas_src>
import jax
import jax.numpy as jnp
from jax.experimental import pallas as pl
from jax.experimental.pallas import tpu as pltpu

EPS = 1e-5  # PyTorch InstanceNorm2d default eps, affine=False


def _round_up(x, m):
    return (x + m - 1) // m * m


def _make_conv_in_relu_kernel(tap_offsets, m_span, inv_m, use_act):
    """tap_offsets: flat source offset per (ky,kx) tap. m_span: lane-padded output span.
    inv_m: 1 / (Ho*Wo) true element count for the instance-norm statistics."""

    def kernel(x_ref, w_ref, mask_ref, o_ref):
        # x_ref:    (C_in, L)         bf16  zero-padded, flattened padded image
        # w_ref:    (T, C_out, C_in)  bf16  per-tap weight matrices
        # mask_ref: (1, m_span)       f32   1.0 on valid output positions, 0.0 elsewhere
        # o_ref:    (C_out, m_span)   output dtype

        # Convolution hot path: in-kernel tap expansion -> 9 shifted slices + 9 MXU matmuls.
        y = None
        for t, start in enumerate(tap_offsets):
            xs = x_ref[:, pl.ds(start, m_span)]                       # (C_in, m_span) bf16
            part = jnp.dot(w_ref[t], xs, preferred_element_type=jnp.float32)
            y = part if y is None else y + part                       # (C_out, m_span) f32

        # InstanceNorm statistics over valid positions only (mask kills pad-column / tail garbage).
        # Conv bias is omitted: the mean subtraction below cancels it exactly.
        mask = mask_ref[...]                                          # (1, m_span)
        ym = y * mask
        s = jnp.sum(ym, axis=1, keepdims=True)                        # (C_out, 1)
        s2 = jnp.sum(ym * y, axis=1, keepdims=True)                   # sum of y^2 on valid pos
        mean = s * inv_m
        var = jnp.maximum(s2 * inv_m - mean * mean, 0.0)
        out = (y - mean) * jax.lax.rsqrt(var + EPS)
        if use_act:
            out = jnp.maximum(out, 0.0)
        o_ref[...] = out.astype(o_ref.dtype)

    return kernel


def conv_block_pallas(x, w, b=None, *, stride=1, padding=1, use_act=True):
    """x: (N, C_in, H, W) NCHW; w: (C_out, C_in, KH, KW); b: (C_out,) (cancelled by InstanceNorm)."""
    del b  # per-channel bias is mathematically cancelled by InstanceNorm's mean subtraction
    if stride != 1:
        raise NotImplementedError("conv_block_pallas only supports stride=1")  # TODO(synk)
    N, C_in, H, W = x.shape
    C_out, _, KH, KW = w.shape
    p = padding
    Hp, Wp = H + 2 * p, W + 2 * p
    Ho, Wo = Hp - KH + 1, Wp - KW + 1
    M_true = Ho * Wo

    # Flat-span geometry: output (h, w) lives at flat position t = h*Wp + w of the padded image
    # offset by (p0 = (KH//... ) -- concretely source slice for tap (ky,kx) starts at ky*Wp + kx.
    span = (Ho - 1) * Wp + Wo                 # contiguous flat region covering all outputs
    m_span = _round_up(span, 128)             # lane-dense output width
    max_start = (KH - 1) * Wp + (KW - 1)
    L = _round_up(max_start + m_span, 128)    # >= Hp*Wp by construction

    # --- glue: zero-pad (spatial + channel-to-8) and flatten, in bf16 ---
    C_in_pad = _round_up(C_in, 8)
    xb = jnp.pad(x.astype(jnp.bfloat16),
                 ((0, 0), (0, C_in_pad - C_in), (p, p), (p, p)))      # (N, C_in_pad, Hp, Wp)
    xflat = xb.reshape(N, C_in_pad, Hp * Wp)
    xflat = jnp.pad(xflat, ((0, 0), (0, 0), (0, L - Hp * Wp)))        # zero tail, harmless

    # Per-tap (C_out, C_in_pad) weight matrices, tap-major; order matches tap_offsets below.
    w_taps = jnp.transpose(w, (2, 3, 0, 1)).reshape(KH * KW, C_out, C_in)
    w_taps = jnp.pad(w_taps, ((0, 0), (0, 0), (0, C_in_pad - C_in))).astype(jnp.bfloat16)

    # Validity mask over the flat span: column must land inside [0, Wo) of a real output row.
    t_idx = jnp.arange(m_span)
    mask = (((t_idx % Wp) < Wo) & (t_idx < span)).astype(jnp.float32).reshape(1, m_span)

    tap_offsets = tuple(ky * Wp + kx for ky in range(KH) for kx in range(KW))
    kernel = _make_conv_in_relu_kernel(tap_offsets, m_span, 1.0 / M_true, use_act)

    out_itemsize = jnp.dtype(x.dtype).itemsize
    cost = pl.CostEstimate(
        flops=2 * N * C_out * C_in_pad * KH * KW * m_span,
        transcendentals=N * C_out,
        bytes_accessed=(xflat.size * 2 + w_taps.size * 2 + mask.size * 4
                        + N * C_out * m_span * out_itemsize),
    )

    y = pl.pallas_call(
        kernel,
        out_shape=jax.ShapeDtypeStruct((N, C_out, m_span), x.dtype),
        grid_spec=pltpu.PrefetchScalarGridSpec(
            num_scalar_prefetch=0,
            grid=(N,),
            in_specs=[
                pl.BlockSpec((pl.Squeezed(), C_in_pad, L), lambda n: (n, 0, 0)),
                pl.BlockSpec((KH * KW, C_out, C_in_pad), lambda n: (0, 0, 0)),
                pl.BlockSpec((1, m_span), lambda n: (0, 0)),
            ],
            out_specs=pl.BlockSpec((pl.Squeezed(), C_out, m_span), lambda n: (n, 0, 0)),
        ),
        compiler_params=pltpu.CompilerParams(dimension_semantics=("parallel",)),
        cost_estimate=cost,
    )(xflat, w_taps, mask)

    # Extract the valid positions: output (h, w) sits at flat position h*Wp + w.
    need = Ho * Wp
    if m_span < need:
        y = jnp.pad(y, ((0, 0), (0, 0), (0, need - m_span)))
    else:
        y = y[:, :, :need]
    return y.reshape(N, C_out, Ho, Wp)[:, :, :, :Wo]


def conv_block_ref(x, w, b, *, stride=1, padding=1):
    """Pure-JAX reference matching PyTorch Conv2d(+bias) + InstanceNorm2d + ReLU (f32)."""
    y = jax.lax.conv_general_dilated(
        x, w, window_strides=(stride, stride),
        padding=((padding, padding), (padding, padding)),
        dimension_numbers=("NCHW", "OIHW", "NCHW"))
    y = y + b[None, :, None, None]
    mean = jnp.mean(y, axis=(2, 3), keepdims=True)
    var = jnp.mean((y - mean) ** 2, axis=(2, 3), keepdims=True)
    y = (y - mean) * jax.lax.rsqrt(var + EPS)
    return jnp.maximum(y, 0.0)


if __name__ == "__main__":
    # ConvBlock(in_channels=4, out_channels=8, down=True, use_act=True,
    #           kernel_size=3, stride=1, padding=1)
    N, C_in, C_out, H, W = 2, 4, 8, 16, 16
    KH = KW = 3

    key = jax.random.PRNGKey(0)
    kx_, kw_, kb_ = jax.random.split(key, 3)
    x = jax.random.normal(kx_, (N, C_in, H, W), jnp.float32)
    fan_in = C_in * KH * KW
    bound = 1.0 / (fan_in ** 0.5)
    w = jax.random.uniform(kw_, (C_out, C_in, KH, KW), jnp.float32, -bound, bound)
    b = jax.random.uniform(kb_, (C_out,), jnp.float32, -bound, bound)

    out = conv_block_pallas(x, w, b, stride=1, padding=1)
    out = jax.block_until_ready(out)

    ref = conv_block_ref(x, w, b, stride=1, padding=1)
    assert out.shape == (N, C_out, H, W), out.shape
    # Tolerance sized for bf16 MXU operands (f32 accumulation); reference is full f32 and
    # includes the conv bias, confirming the bias is cancelled by InstanceNorm.
    max_err = float(jnp.max(jnp.abs(out - ref)))
    assert jnp.allclose(out, ref, atol=3e-2, rtol=3e-2), max_err
    print("KERNEL_OK")
</pallas_src>

<mosaic_0001>
module attributes {stable_mosaic.version = 11 : i64} {
  func.func @kernel(%arg0: i32, %arg1: memref<1x8x512xbf16, #tpu.memory_space<vmem>>, %arg2: memref<9x8x8xbf16, #tpu.memory_space<vmem>>, %arg3: memref<1x384xf32, #tpu.memory_space<vmem>>, %arg4: memref<1x8x384xf32, #tpu.memory_space<vmem>>) attributes {dimension_semantics = [#tpu.dimension_semantics<parallel>], iteration_bounds = array<i64: 2>, scalar_prefetch = 0 : i64, scratch_operands = 0 : i64, tpu.core_type = #tpu.core_type<tc>, window_params = [{transform_indices = @transform_0, window_bounds = array<i64: 1, 8, 512>}, {pipeline_mode = #tpu.pipeline_mode<synchronous>, transform_indices = @transform_1, window_bounds = array<i64: 9, 8, 8>}, {pipeline_mode = #tpu.pipeline_mode<synchronous>, transform_indices = @transform_2, window_bounds = array<i64: 1, 384>}, {transform_indices = @transform_3, window_bounds = array<i64: 1, 8, 384>}]} {
    %c0 = arith.constant 0 : index
    %c0_0 = arith.constant 0 : index
    %c0_1 = arith.constant 0 : index
    %0 = vector.load %arg1[%c0, %c0_0, %c0_1] : memref<1x8x512xbf16, #tpu.memory_space<vmem>>, vector<1x8x384xbf16>
    %1 = vector.shape_cast %0 : vector<1x8x384xbf16> to vector<8x384xbf16>
    %c0_2 = arith.constant 0 : index
    %c0_3 = arith.constant 0 : index
    %c0_4 = arith.constant 0 : index
    %2 = vector.load %arg2[%c0_2, %c0_3, %c0_4] : memref<9x8x8xbf16, #tpu.memory_space<vmem>>, vector<1x8x8xbf16>
    %3 = vector.shape_cast %2 : vector<1x8x8xbf16> to vector<8x8xbf16>
    %cst = arith.constant dense<0.000000e+00> : vector<8x384xf32>
    %4 = tpu.matmul %3, %1, %cst {dimension_numbers = #tpu.dot_dimension_numbers<[1], [0], [0], [1], [0, 0, 1, 1], [], []>} : vector<8x8xbf16>, vector<8x384xbf16>, vector<8x384xf32> -> vector<8x384xf32>
    %c0_5 = arith.constant 0 : index
    %c0_6 = arith.constant 0 : index
    %c1 = arith.constant 1 : index
    %5 = vector.load %arg1[%c0_5, %c0_6, %c1] : memref<1x8x512xbf16, #tpu.memory_space<vmem>>, vector<1x8x384xbf16>
    %6 = vector.shape_cast %5 : vector<1x8x384xbf16> to vector<8x384xbf16>
    %c1_7 = arith.constant 1 : index
    %c0_8 = arith.constant 0 : index
    %c0_9 = arith.constant 0 : index
    %7 = vector.load %arg2[%c1_7, %c0_8, %c0_9] : memref<9x8x8xbf16, #tpu.memory_space<vmem>>, vector<1x8x8xbf16>
    %8 = vector.shape_cast %7 : vector<1x8x8xbf16> to vector<8x8xbf16>
    %cst_10 = arith.constant dense<0.000000e+00> : vector<8x384xf32>
    %9 = tpu.matmul %8, %6, %cst_10 {dimension_numbers = #tpu.dot_dimension_numbers<[1], [0], [0], [1], [0, 0, 1, 1], [], []>} : vector<8x8xbf16>, vector<8x384xbf16>, vector<8x384xf32> -> vector<8x384xf32>
    %10 = arith.addf %4, %9 : vector<8x384xf32>
    %c0_11 = arith.constant 0 : index
    %c0_12 = arith.constant 0 : index
    %c2 = arith.constant 2 : index
    %11 = vector.load %arg1[%c0_11, %c0_12, %c2] : memref<1x8x512xbf16, #tpu.memory_space<vmem>>, vector<1x8x384xbf16>
    %12 = vector.shape_cast %11 : vector<1x8x384xbf16> to vector<8x384xbf16>
    %c2_13 = arith.constant 2 : index
    %c0_14 = arith.constant 0 : index
    %c0_15 = arith.constant 0 : index
    %13 = vector.load %arg2[%c2_13, %c0_14, %c0_15] : memref<9x8x8xbf16, #tpu.memory_space<vmem>>, vector<1x8x8xbf16>
    %14 = vector.shape_cast %13 : vector<1x8x8xbf16> to vector<8x8xbf16>
    %cst_16 = arith.constant dense<0.000000e+00> : vector<8x384xf32>
    %15 = tpu.matmul %14, %12, %cst_16 {dimension_numbers = #tpu.dot_dimension_numbers<[1], [0], [0], [1], [0, 0, 1, 1], [], []>} : vector<8x8xbf16>, vector<8x384xbf16>, vector<8x384xf32> -> vector<8x384xf32>
    %16 = arith.addf %10, %15 : vector<8x384xf32>
    %c0_17 = arith.constant 0 : index
    %c0_18 = arith.constant 0 : index
    %c18 = arith.constant 18 : index
    %17 = vector.load %arg1[%c0_17, %c0_18, %c18] : memref<1x8x512xbf16, #tpu.memory_space<vmem>>, vector<1x8x384xbf16>
    %18 = vector.shape_cast %17 : vector<1x8x384xbf16> to vector<8x384xbf16>
    %c3 = arith.constant 3 : index
    %c0_19 = arith.constant 0 : index
    %c0_20 = arith.constant 0 : index
    %19 = vector.load %arg2[%c3, %c0_19, %c0_20] : memref<9x8x8xbf16, #tpu.memory_space<vmem>>, vector<1x8x8xbf16>
    %20 = vector.shape_cast %19 : vector<1x8x8xbf16> to vector<8x8xbf16>
    %cst_21 = arith.constant dense<0.000000e+00> : vector<8x384xf32>
    %21 = tpu.matmul %20, %18, %cst_21 {dimension_numbers = #tpu.dot_dimension_numbers<[1], [0], [0], [1], [0, 0, 1, 1], [], []>} : vector<8x8xbf16>, vector<8x384xbf16>, vector<8x384xf32> -> vector<8x384xf32>
    %22 = arith.addf %16, %21 : vector<8x384xf32>
    %c0_22 = arith.constant 0 : index
    %c0_23 = arith.constant 0 : index
    %c19 = arith.constant 19 : index
    %23 = vector.load %arg1[%c0_22, %c0_23, %c19] : memref<1x8x512xbf16, #tpu.memory_space<vmem>>, vector<1x8x384xbf16>
    %24 = vector.shape_cast %23 : vector<1x8x384xbf16> to vector<8x384xbf16>
    %c4 = arith.constant 4 : index
    %c0_24 = arith.constant 0 : index
    %c0_25 = arith.constant 0 : index
    %25 = vector.load %arg2[%c4, %c0_24, %c0_25] : memref<9x8x8xbf16, #tpu.memory_space<vmem>>, vector<1x8x8xbf16>
    %26 = vector.shape_cast %25 : vector<1x8x8xbf16> to vector<8x8xbf16>
    %cst_26 = arith.constant dense<0.000000e+00> : vector<8x384xf32>
    %27 = tpu.matmul %26, %24, %cst_26 {dimension_numbers = #tpu.dot_dimension_numbers<[1], [0], [0], [1], [0, 0, 1, 1], [], []>} : vector<8x8xbf16>, vector<8x384xbf16>, vector<8x384xf32> -> vector<8x384xf32>
    %28 = arith.addf %22, %27 : vector<8x384xf32>
    %c0_27 = arith.constant 0 : index
    %c0_28 = arith.constant 0 : index
    %c20 = arith.constant 20 : index
    %29 = vector.load %arg1[%c0_27, %c0_28, %c20] : memref<1x8x512xbf16, #tpu.memory_space<vmem>>, vector<1x8x384xbf16>
    %30 = vector.shape_cast %29 : vector<1x8x384xbf16> to vector<8x384xbf16>
    %c5 = arith.constant 5 : index
    %c0_29 = arith.constant 0 : index
    %c0_30 = arith.constant 0 : index
    %31 = vector.load %arg2[%c5, %c0_29, %c0_30] : memref<9x8x8xbf16, #tpu.memory_space<vmem>>, vector<1x8x8xbf16>
    %32 = vector.shape_cast %31 : vector<1x8x8xbf16> to vector<8x8xbf16>
    %cst_31 = arith.constant dense<0.000000e+00> : vector<8x384xf32>
    %33 = tpu.matmul %32, %30, %cst_31 {dimension_numbers = #tpu.dot_dimension_numbers<[1], [0], [0], [1], [0, 0, 1, 1], [], []>} : vector<8x8xbf16>, vector<8x384xbf16>, vector<8x384xf32> -> vector<8x384xf32>
    %34 = arith.addf %28, %33 : vector<8x384xf32>
    %c0_32 = arith.constant 0 : index
    %c0_33 = arith.constant 0 : index
    %c36 = arith.constant 36 : index
    %35 = vector.load %arg1[%c0_32, %c0_33, %c36] : memref<1x8x512xbf16, #tpu.memory_space<vmem>>, vector<1x8x384xbf16>
    %36 = vector.shape_cast %35 : vector<1x8x384xbf16> to vector<8x384xbf16>
    %c6 = arith.constant 6 : index
    %c0_34 = arith.constant 0 : index
    %c0_35 = arith.constant 0 : index
    %37 = vector.load %arg2[%c6, %c0_34, %c0_35] : memref<9x8x8xbf16, #tpu.memory_space<vmem>>, vector<1x8x8xbf16>
    %38 = vector.shape_cast %37 : vector<1x8x8xbf16> to vector<8x8xbf16>
    %cst_36 = arith.constant dense<0.000000e+00> : vector<8x384xf32>
    %39 = tpu.matmul %38, %36, %cst_36 {dimension_numbers = #tpu.dot_dimension_numbers<[1], [0], [0], [1], [0, 0, 1, 1], [], []>} : vector<8x8xbf16>, vector<8x384xbf16>, vector<8x384xf32> -> vector<8x384xf32>
    %40 = arith.addf %34, %39 : vector<8x384xf32>
    %c0_37 = arith.constant 0 : index
    %c0_38 = arith.constant 0 : index
    %c37 = arith.constant 37 : index
    %41 = vector.load %arg1[%c0_37, %c0_38, %c37] : memref<1x8x512xbf16, #tpu.memory_space<vmem>>, vector<1x8x384xbf16>
    %42 = vector.shape_cast %41 : vector<1x8x384xbf16> to vector<8x384xbf16>
    %c7 = arith.constant 7 : index
    %c0_39 = arith.constant 0 : index
    %c0_40 = arith.constant 0 : index
    %43 = vector.load %arg2[%c7, %c0_39, %c0_40] : memref<9x8x8xbf16, #tpu.memory_space<vmem>>, vector<1x8x8xbf16>
    %44 = vector.shape_cast %43 : vector<1x8x8xbf16> to vector<8x8xbf16>
    %cst_41 = arith.constant dense<0.000000e+00> : vector<8x384xf32>
    %45 = tpu.matmul %44, %42, %cst_41 {dimension_numbers = #tpu.dot_dimension_numbers<[1], [0], [0], [1], [0, 0, 1, 1], [], []>} : vector<8x8xbf16>, vector<8x384xbf16>, vector<8x384xf32> -> vector<8x384xf32>
    %46 = arith.addf %40, %45 : vector<8x384xf32>
    %c0_42 = arith.constant 0 : index
    %c0_43 = arith.constant 0 : index
    %c38 = arith.constant 38 : index
    %47 = vector.load %arg1[%c0_42, %c0_43, %c38] : memref<1x8x512xbf16, #tpu.memory_space<vmem>>, vector<1x8x384xbf16>
    %48 = vector.shape_cast %47 : vector<1x8x384xbf16> to vector<8x384xbf16>
    %c8 = arith.constant 8 : index
    %c0_44 = arith.constant 0 : index
    %c0_45 = arith.constant 0 : index
    %49 = vector.load %arg2[%c8, %c0_44, %c0_45] : memref<9x8x8xbf16, #tpu.memory_space<vmem>>, vector<1x8x8xbf16>
    %50 = vector.shape_cast %49 : vector<1x8x8xbf16> to vector<8x8xbf16>
    %cst_46 = arith.constant dense<0.000000e+00> : vector<8x384xf32>
    %51 = tpu.matmul %50, %48, %cst_46 {dimension_numbers = #tpu.dot_dimension_numbers<[1], [0], [0], [1], [0, 0, 1, 1], [], []>} : vector<8x8xbf16>, vector<8x384xbf16>, vector<8x384xf32> -> vector<8x384xf32>
    %52 = arith.addf %46, %51 : vector<8x384xf32>
    %c0_47 = arith.constant 0 : index
    %c0_48 = arith.constant 0 : index
    %53 = vector.load %arg3[%c0_47, %c0_48] : memref<1x384xf32, #tpu.memory_space<vmem>>, vector<1x384xf32>
    %54 = vector.broadcast %53 : vector<1x384xf32> to vector<8x384xf32>
    %55 = arith.mulf %52, %54 : vector<8x384xf32>
    %cst_49 = arith.constant dense<0.000000e+00> : vector<8xf32>
    %56 = vector.multi_reduction <add>, %55, %cst_49 [1] : vector<8x384xf32> to vector<8xf32>
    %57 = vector.shape_cast %56 : vector<8xf32> to vector<8x1xf32>
    %58 = arith.mulf %55, %52 : vector<8x384xf32>
    %cst_50 = arith.constant dense<0.000000e+00> : vector<8xf32>
    %59 = vector.multi_reduction <add>, %58, %cst_50 [1] : vector<8x384xf32> to vector<8xf32>
    %60 = vector.shape_cast %59 : vector<8xf32> to vector<8x1xf32>
    %cst_51 = arith.constant 3.906250e-03 : f32
    %61 = vector.broadcast %cst_51 : f32 to vector<8x1xf32>
    %62 = arith.mulf %57, %61 : vector<8x1xf32>
    %cst_52 = arith.constant 3.906250e-03 : f32
    %63 = vector.broadcast %cst_52 : f32 to vector<8x1xf32>
    %64 = arith.mulf %60, %63 : vector<8x1xf32>
    %65 = arith.mulf %62, %62 : vector<8x1xf32>
    %66 = arith.subf %64, %65 : vector<8x1xf32>
    %cst_53 = arith.constant 0.000000e+00 : f32
    %67 = vector.broadcast %cst_53 : f32 to vector<8x1xf32>
    %68 = arith.maximumf %66, %67 : vector<8x1xf32>
    %69 = vector.broadcast %62 : vector<8x1xf32> to vector<8x384xf32>
    %70 = arith.subf %52, %69 : vector<8x384xf32>
    %cst_54 = arith.constant 9.99999974E-6 : f32
    %71 = vector.broadcast %cst_54 : f32 to vector<8x1xf32>
    %72 = arith.addf %68, %71 : vector<8x1xf32>
    %73 = math.rsqrt %72 : vector<8x1xf32>
    %74 = vector.broadcast %73 : vector<8x1xf32> to vector<8x384xf32>
    %75 = arith.mulf %70, %74 : vector<8x384xf32>
    %cst_55 = arith.constant 0.000000e+00 : f32
    %76 = vector.broadcast %cst_55 : f32 to vector<8x384xf32>
    %77 = arith.maximumf %75, %76 : vector<8x384xf32>
    %c0_56 = arith.constant 0 : index
    %c0_57 = arith.constant 0 : index
    %c0_58 = arith.constant 0 : index
    %78 = vector.load %arg4[%c0_56, %c0_57, %c0_58] : memref<1x8x384xf32, #tpu.memory_space<vmem>>, vector<1x8x384xf32>
    %79 = vector.shape_cast %78 : vector<1x8x384xf32> to vector<8x384xf32>
    %80 = vector.shape_cast %77 : vector<8x384xf32> to vector<1x8x384xf32>
    tpu.vector_store %arg4[%c0_56, %c0_57, %c0_58], %80 {strides = array<i32>} : memref<1x8x384xf32, #tpu.memory_space<vmem>>, vector<1x8x384xf32>,
    return
  }
  func.func @transform_0(%arg0: i32) -> (i32, i32, i32) {
    %c0_i32 = arith.constant 0 : i32
    %c0_i32_0 = arith.constant 0 : i32
    %c0_i32_1 = arith.constant 0 : i32
    return %arg0, %c0_i32, %c0_i32_0 : i32, i32, i32
  }
  func.func @transform_1(%arg0: i32) -> (i32, i32, i32) {
    %c0_i32 = arith.constant 0 : i32
    %c0_i32_0 = arith.constant 0 : i32
    %c0_i32_1 = arith.constant 0 : i32
    %c0_i32_2 = arith.constant 0 : i32
    return %c0_i32, %c0_i32_0, %c0_i32_1 : i32, i32, i32
  }
  func.func @transform_2(%arg0: i32) -> (i32, i32) {
    %c0_i32 = arith.constant 0 : i32
    %c0_i32_0 = arith.constant 0 : i32
    %c0_i32_1 = arith.constant 0 : i32
    return %c0_i32, %c0_i32_0 : i32, i32
  }
  func.func @transform_3(%arg0: i32) -> (i32, i32, i32) {
    %c0_i32 = arith.constant 0 : i32
    %c0_i32_0 = arith.constant 0 : i32
    %c0_i32_1 = arith.constant 0 : i32
    return %arg0, %c0_i32, %c0_i32_0 : i32, i32, i32
  }
}

</mosaic_0001>

<bundles_post_ra>
// kernel: tpu_custom_call.1
= control target key start
LH: loop header
LB: loop body
LE: loop exit
PB: predicated region body
PF: predicated region fallthrough
CT: control target
= control target key end

     0   :  { %8 = vsyncpa [#allocation3], 0  ;;  %s1866_s0 = inlined_call_operand.vmem [shape: bf16[2,8,512], index: 0, kind: input, shape index: {}]   ;;  %s1867_s1 = inlined_call_operand.vmem [shape: bf16[9,8,8], index: 1, kind: input, shape index: {}]   ;;  %s1868_s2 = inlined_call_operand.vmem [shape: f32[1,384], index: 2, kind: input, shape index: {}]   ;;  %s1869_s3 = inlined_call_operand.hbm [shape: f32[2,8,384], index: 3, kind: output, shape index: {}]  }
   0x1   :  { %10 = vsyncpa [#allocation3 + $0x1], 0  ;;  %s1632_s12 = smov 0   ;;  %s1634_s13 = smov 0  }
   0x2   :  { %s1636_s14 = smov 0   ;;  %s1638_s15 = smov 0  }
   0x3 LB: > { %s1653_s16 = sadd.s32 4294967295, %s1598_s15   ;;  %s1289_s17 = sadd.s32 4294967294, %s1598_s15   ;;  %s1598_s15 = sphi %s1638_s15, %s1875_s15   ;;  %s1594_s14 = sphi %s1636_s14, %s1874_s14   ;;  %s1590_s13 = sphi %s1634_s13, %s1873_s13   ;;  %s1586_s12 = sphi %s1632_s12, %s1872_s12  }
   0x4   : > { %s1657_s18 = sadd.s32 1, %s1598_s15   ;;  %s91_s19 = sadd.s32 1, %s1594_s14 }
   0x5   : > { %s88_s20 = ssub.s32 %s1598_s15, %s1657_s18  ;;  %p101_p0 = scmp.ne.s32.totalorder %s1594_s14, %s1590_s13 }
   0x6   : > { %p89_p1 = scmp.eq.s32.totalorder %s88_s20, 0  ;;  %p102_p2 = scmp.eq.s32.totalorder %s1653_s16, 1 }
   0x7   : > { %p107_p3 = scmp.ne.s32.totalorder %s1590_s13, %s1586_s12  ;;  %p108_p4 = scmp.eq.s32.totalorder %s1289_s17, 1 }
   0x8   : > { %s1668_s21 = scalar_select %p89_p1, %s1594_s14, %s91_s19  }
   0x9   : > { %p1670_p5 = por %p102_p2, %p101_p0  ;;  %p1674_p6 = por %p108_p4, %p107_p3 }
   0xa   : > { %p1292_p7 = scmp.ge.s32.totalorder %s1598_s15, 1  ;;  %p140_p8 = scmp.lt.s32.totalorder %s1598_s15, 3 }
   0xc   : > { %p141_p9 = pnand %p1292_p7, %p140_p8 }
   0xd   : > { %p164_p10 = scmp.lt.s32.totalorder (!%p141_p9), %s1653_s16, 1  ;;  %v1600_v0 = vmov (!%p141_p9), 0.0   ;;  %v1601_v1 = vmov (!%p141_p9), 0   ;;  %vm1602_vm0 = vmmov (!%p141_p9), 0   ;;  %s1603_s29 = smov (!%p141_p9), 127   ;;  %vm195_vm1 = vcmask (!%p141_p9), 1039360  }
   0xe   : > { %144 = sbr.rel (%p141_p9) target bundleno = 649 (0x289), region = 32  ;;  %1359 = vmatprep.subr.bf16.mxu1 (!%p141_p9), %v1600_v0  ;;  %245 = vmatprep.mubr.bf16.mxu0 (!%p141_p9), %v1601_v1  ;;  %s1604_s30 = smov (!%p141_p9), 126   ;;  %vm203_vm2 = vcmask (!%p141_p9), 1043456   ;;  %v1295_v18 = vld [vmem:[%s1867_s1 + $0x4] sm:$0xf] (!%p141_p9)  ;;  %vm199_vm3 = vcmask (!%p141_p9), 64512  }
   0xf   : > { %1361 = vmatprep.mubr.msk.bf16.mxu1 (!%p141_p9), %vm1602_vm0, %v1600_v0  ;;  %s1605_s4 = smov (!%p141_p9), 110   ;;  %s1606_s5 = smov (!%p141_p9), 109   ;;  %vm405_vm4 = vcmask (!%p141_p9), 1031168   ;;  %v172_v29 = vld [vmem:[%s1867_s1] sm:$0xf] (!%p141_p9)  ;;  %vm515_vm5 = vcmask (!%p141_p9), 900096  }
  0x10   : > { %s1607_s6 = smov (!%p141_p9), 108   ;;  %s1608_s7 = smov (!%p141_p9), 92   ;;  %v1309_v39 = vld [vmem:[%s1867_s1 + $0x8] sm:$0xf] (!%p141_p9)  ;;  %vm625_vm6 = vcmask (!%p141_p9), 891904   ;;  %vm735_vm7 = vcmask (!%p141_p9), 883712  }
  0x11   : > { %s1609_s8 = smov (!%p141_p9), 91   ;;  %s1610_s9 = smov (!%p141_p9), 90   ;;  %v1313_v49 = vld [vmem:[%s1867_s1 + $0xc] sm:$0xf] (!%p141_p9)  ;;  %v1317_v59 = vld [vmem:[%s1867_s1 + $0x10] sm:$0xf] (!%p141_p9) }
  0x12   : > { %vm845_vm8 = vcmask (!%p141_p9), 752640   ;;  %vm955_vm9 = vcmask (!%p141_p9), 744448   ;;  %vm1065_vm10 = vcmask (!%p141_p9), 736256   ;;  %s161_s17 = sand.u32 (!%p141_p9), 1, %s1590_s13   ;;  %s1478_s20 = smul.u32 (!%p141_p9), 384, %s1653_s16 }
  0x13   : > { %s1477_s19 = smul.u32 (!%p141_p9), 24, %s161_s17 }
  0x15   : > { %s165_s24 = scalar_select %p164_p10, %s1653_s16, 1 }
  0x16   : > { %s1216_s16 = scalar_lea.sflag [#allocation3], %s161_s17 }
  0x17   : > { %s1340_s25 = sshll.u32 %s165_s24, 4  ;;  %s163_s24 = scalar_lea.vmem [#allocation2], %s1477_s19 }
  0x18   : > { %s1689_s28 = scalar_lea.vmem %s1866_s0, %s1340_s25  ;;  %s1230_s25 = sshll.u32 %s163_s24, 4  ;;  %s1826_s25 = int_to_ptr.vmem [resolvable:$true] %s1230_s25 }
  0x19   : > { %v174_v2 = vld [vmem:[%s1689_s28 + $0x8] sm:$0xff]  ;;  %v173_v3 = vld [vmem:[%s1689_s28] sm:$0xff] }
  0x1a   : > { %v1298_v4 = vcombine.low %v174_v2, %v174_v2  ;;  %v1296_v5 = vcombine.low %v173_v3, %v173_v3  ;;  %v1299_v6 = vcombine.high %v174_v2, %v174_v2  ;;  %v1297_v7 = vcombine.high %v173_v3, %v173_v3  ;;  %v1533_v12 = vld [vmem:[%s1689_s28 + $0x8] ss:$0 sps:$4 sm:$0xff]   ;;  %s1824_s28 = scalar_lea.hbm %s1869_s3, %s1478_s20 }
  0x1b   : > { %v312_v20 = vsel %vm203_vm2, %v1533_v12, 0 }
  0x1c   : > { %191 = vrot.lane.b32.xlu1 %v1298_v4, %s1603_s29  ;;  %187 = vrot.lane.b32.xlu0 %v1296_v5, %s1603_s29  ;;  %v306_v19 = vsel %vm203_vm2, %v1296_v5, 0 }
  0x20   : > { %193 = vrot.lane.b32.xlu1 %v1299_v6, %s1603_s29  ;;  %189 = vrot.lane.b32.xlu0 %v1297_v7, %s1603_s29  ;;  %s1536_s29 = scalar_lea.vmem %s1826_s25, 384 }
  0x21   : > { %p1537_p11 = scmp.ne.s32.totalorder %s1826_s25, %s1536_s29 }
  0x23   : > { %p1538_p12 = pnand %p1537_p11, %p1670_p5 }
  0x24   : > { %397 = vrot.lane.b32.xlu0 %v1296_v5, %s1604_s30  ;;  %399 = vrot.lane.b32.xlu1 %v1297_v7, %s1604_s30 }
  0x25   : > { %p1539_p13 = pneg %p1538_p12 }
  0x28   : > { %401 = vrot.lane.b32.xlu0 %v1298_v4, %s1604_s30  ;;  %403 = vrot.lane.b32.xlu1 %v1299_v6, %s1604_s30  ;;  %s1611_s30 = smov [#allocation2]  }
  0x2c   : > { %507 = vrot.lane.b32.xlu0 %v1296_v5, %s1605_s4  ;;  %509 = vrot.lane.b32.xlu1 %v1297_v7, %s1605_s4 }
  0x30   : > { %511 = vrot.lane.b32.xlu0 %v1298_v4, %s1605_s4  ;;  %513 = vrot.lane.b32.xlu1 %v1299_v6, %s1605_s4  ;;  %s1540_s4 = sshll.u32 %s1611_s30, 4  ;;  %s1541_s4 = int_to_ptr.vmem [resolvable:$false] %s1540_s4 }
  0x31   : > { %p1543_p0 = scmp.lt.s32.totalorder %s1826_s25, %s1541_s4 }
  0x34   : > { %617 = vrot.lane.b32.xlu0 %v1296_v5, %s1606_s5  ;;  %619 = vrot.lane.b32.xlu1 %v1297_v7, %s1606_s5 }
  0x38   : > { %621 = vrot.lane.b32.xlu0 %v1298_v4, %s1606_s5  ;;  %623 = vrot.lane.b32.xlu1 %v1299_v6, %s1606_s5  ;;  %s1542_s5 = scalar_lea.vmem %s1541_s4, 768 }
  0x39   : > { %p1544_p1 = scmp.lt.s32.totalorder %s1542_s5, %s1536_s29 }
  0x3b   : > { %p1545_p2 = por %p1544_p1, %p1543_p0 }
  0x3c   : > { %727 = vrot.lane.b32.xlu0 %v1296_v5, %s1607_s6  ;;  %729 = vrot.lane.b32.xlu1 %v1297_v7, %s1607_s6 }
  0x3d   : > { %p1546_p3 = pnand %p1545_p2, %p1539_p13 }
  0x40   : > { %731 = vrot.lane.b32.xlu0 %v1298_v4, %s1607_s6  ;;  %733 = vrot.lane.b32.xlu1 %v1299_v6, %s1607_s6 }
  0x44   : > { %837 = vrot.lane.b32.xlu0 %v1296_v5, %s1608_s7  ;;  %839 = vrot.lane.b32.xlu1 %v1297_v7, %s1608_s7 }
  0x48   : > { %841 = vrot.lane.b32.xlu0 %v1298_v4, %s1608_s7  ;;  %843 = vrot.lane.b32.xlu1 %v1299_v6, %s1608_s7 }
  0x4c   : > { %947 = vrot.lane.b32.xlu0 %v1296_v5, %s1609_s8  ;;  %949 = vrot.lane.b32.xlu1 %v1297_v7, %s1609_s8 }
  0x50   : > { %951 = vrot.lane.b32.xlu0 %v1298_v4, %s1609_s8  ;;  %953 = vrot.lane.b32.xlu1 %v1299_v6, %s1609_s8 }
  0x54   : > { %1057 = vrot.lane.b32.xlu0 %v1296_v5, %s1610_s9  ;;  %1059 = vrot.lane.b32.xlu1 %v1297_v7, %s1610_s9 }
  0x58   : > { %1061 = vrot.lane.b32.xlu0 %v1298_v4, %s1610_s9  ;;  %1063 = vrot.lane.b32.xlu1 %v1299_v6, %s1610_s9 }
  0x8e   : > { %v192_v8 = vpop.permute.xlu1 %191  ;;  %v188_v9 = vpop.permute.xlu0 %187 }
  0x92   : > { %v194_v10 = vpop.permute.xlu1 %193  ;;  %v190_v11 = vpop.permute.xlu0 %189 }
  0x93   : > { %v197_v13 = vsel %vm195_vm1, %v190_v11, %v192_v8  ;;  %v196_v14 = vsel %vm195_vm1, %v188_v9, %v190_v11  ;;  %v198_v15 = vsel %vm195_vm1, %v192_v8, %v194_v10 }
  0x94   : > { %1300 = vmatprep.subr.msk.bf16.mxu0 %vm203_vm2, %v197_v13  ;;  %v205_v16 = vsel %vm203_vm2, %v196_v14, 0  ;;  %v211_v17 = vsel %vm203_vm2, %v198_v15, 0 }
  0x95   : > { %214 = vmatpush1.bf16.msra.mxu0 %v205_v16  ;;  %1360 = vmatpush3.bf16.msra.mxu1 %v211_v17  ;;  %v1325_v17 = vld [vmem:[%s1867_s1 + $0x18] sm:$0xf] }
  0x96   : > { %1306 = vmatprep.subr.msk.bf16.mxu0 %vm203_vm2, %v1297_v7  ;;  %1365 = vmatprep.subr.bf16.mxu1 %v1600_v0  ;;  %v398_v21 = vpop.permute.xlu0 %397  ;;  %v400_v22 = vpop.permute.xlu1 %399  ;;  %v1321_v7 = vld [vmem:[%s1867_s1 + $0x14] sm:$0xf] }
  0x97   : > { %v406_v27 = vsel %vm405_vm4, %v398_v21, %v400_v22 }
  0x98   : > { %1301 = vmatmul.mubr.msk.bf16.vlgmr.msra.gmra.mrb[0].mxu0 %vm199_vm3, %v1295_v18  ;;  %1362 = vmatmul.mubr.msk.bf16.vlgmr.msra.gmra.mrb[0].mxu1 %vm199_vm3, %v1295_v18  ;;  %v413_v31 = vsel %vm203_vm2, %v406_v27, 0 }
  0x99   : > { %315 = vmatpush1.bf16.msra.mxu0 %v306_v19  ;;  %1366 = vmatpush3.bf16.msra.mxu1 %v312_v20 }
  0x9a   : > { %v402_v23 = vpop.permute.xlu0 %401  ;;  %346 = vmatprep.mubr.bf16.mxu0 %v1601_v1  ;;  %1367 = vmatprep.mubr.msk.bf16.mxu1 %vm1602_vm0, %v1600_v0  ;;  %v404_v25 = vpop.permute.xlu1 %403 }
  0x9b   : > { %v407_v24 = vsel %vm405_vm4, %v400_v22, %v402_v23  ;;  %1371 = vmatprep.subr.bf16.mxu1 %v1600_v0  ;;  %v408_v28 = vsel %vm405_vm4, %v402_v23, %v404_v25 }
  0x9c   : > { %1310 = vmatprep.subr.msk.bf16.mxu0 %vm203_vm2, %v407_v24  ;;  %v419_v32 = vsel %vm203_vm2, %v408_v28, 0 }
  0x9e   : > { %v508_v26 = vpop.permute.xlu0 %507  ;;  %v510_v30 = vpop.permute.xlu1 %509 }
  0x9f   : > { %v516_v37 = vsel %vm515_vm5, %v508_v26, %v510_v30  ;;  %v1329_v26 = vld [vmem:[%s1867_s1 + $0x1c] sm:$0xf] }
  0xa0   : > { %v523_v42 = vsel %vm203_vm2, %v516_v37, 0 }
  0xa2   : > { %v512_v33 = vpop.permute.xlu0 %511  ;;  %v514_v36 = vpop.permute.xlu1 %513 }
  0xa3   : > { %v517_v34 = vsel %vm515_vm5, %v510_v30, %v512_v33  ;;  %v518_v38 = vsel %vm515_vm5, %v512_v33, %v514_v36  ;;  %v1167_v30 = vlaneseq  ;;  %v1165_v33 = vld [vmem:[%s1868_s2] sm:$0x7] }
  0xa4   : > { %1307 = vmatmul.mubr.msk.bf16.vlgmr.msra.gmra.mrb[0].mxu0 %vm199_vm3, %v172_v29  ;;  %1368 = vmatmul.mubr.msk.bf16.vlgmr.msra.gmra.mrb[0].mxu1 %vm199_vm3, %v172_v29  ;;  %v529_v43 = vsel %vm203_vm2, %v518_v38, 0  ;;  %v1333_v29 = vld [vmem:[%s1867_s1 + $0x20] sm:$0xf] }
  0xa5   : > { %422 = vmatpush1.bf16.msra.mxu0 %v413_v31  ;;  %1372 = vmatpush3.bf16.msra.mxu1 %v419_v32  ;;  %v1168_v31 = vshrl.u32 %v1167_v30, 7 }
  0xa6   : > { %453 = vmatprep.mubr.bf16.mxu0 %v1601_v1  ;;  %1373 = vmatprep.mubr.msk.bf16.mxu1 %vm1602_vm0, %v1600_v0  ;;  %v618_v35 = vpop.permute.xlu0 %617  ;;  %v620_v40 = vpop.permute.xlu1 %619 }
  0xa7   : > { %1314 = vmatprep.subr.msk.bf16.mxu0 %vm203_vm2, %v517_v34  ;;  %1377 = vmatprep.subr.bf16.mxu1 %v1600_v0  ;;  %v626_v47 = vsel %vm625_vm6, %v618_v35, %v620_v40  ;;  %v1169_v32 = vsub.s32 0, %v1168_v31  ;;  %v1173_v34 = vsub.s32 1, %v1168_v31 }
  0xa8   : > { %v633_v52 = vsel %vm203_vm2, %v626_v47, 0 }
  0xa9   : > { %v1170_v35 = vrot.slane %v1165_v33, %v1169_v32  ;;  %v1174_v36 = vrot.slane %v1165_v33, %v1173_v34 }
  0xaa   : > { %v622_v41 = vpop.permute.xlu0 %621  ;;  %v624_v46 = vpop.permute.xlu1 %623 }
  0xab   : > { %v627_v44 = vsel %vm625_vm6, %v620_v40, %v622_v41  ;;  %v628_v48 = vsel %vm625_vm6, %v622_v41, %v624_v46 }
  0xac   : > { %v639_v53 = vsel %vm203_vm2, %v628_v48, 0 }
  0xae   : > { %v728_v45 = vpop.permute.xlu0 %727  ;;  %v730_v50 = vpop.permute.xlu1 %729 }
  0xaf   : > { %v736_v57 = vsel %vm735_vm7, %v728_v45, %v730_v50 }
  0xb0   : > { %1311 = vmatmul.mubr.msk.bf16.vlgmr.msra.gmra.mrb[0].mxu0 %vm199_vm3, %v1309_v39  ;;  %1374 = vmatmul.mubr.msk.bf16.vlgmr.msra.gmra.mrb[0].mxu1 %vm199_vm3, %v1309_v39  ;;  %v743_v62 = vsel %vm203_vm2, %v736_v57, 0 }
  0xb1   : > { %532 = vmatpush1.bf16.msra.mxu0 %v523_v42  ;;  %1378 = vmatpush3.bf16.msra.mxu1 %v529_v43 }
  0xb2   : > { %563 = vmatprep.mubr.bf16.mxu0 %v1601_v1  ;;  %1379 = vmatprep.mubr.msk.bf16.mxu1 %vm1602_vm0, %v1600_v0  ;;  %v732_v51 = vpop.permute.xlu0 %731  ;;  %v734_v56 = vpop.permute.xlu1 %733 }
  0xb3   : > { %1318 = vmatprep.subr.msk.bf16.mxu0 %vm203_vm2, %v627_v44  ;;  %1383 = vmatprep.subr.bf16.mxu1 %v1600_v0  ;;  %v737_v54 = vsel %vm735_vm7, %v730_v50, %v732_v51  ;;  %v738_v58 = vsel %vm735_vm7, %v732_v51, %v734_v56 }
  0xb4   : > { %v749_v63 = vsel %vm203_vm2, %v738_v58, 0 }
  0xb6   : > { %v838_v55 = vpop.permute.xlu0 %837  ;;  %v840_v60 = vpop.permute.xlu1 %839 }
  0xb7   : > { %v846_v5 = vsel %vm845_vm8, %v838_v55, %v840_v60 }
  0xb8   : > { %v853_v10 = vsel %vm203_vm2, %v846_v5, 0 }
  0xba   : > { %v842_v61 = vpop.permute.xlu0 %841  ;;  %v844_v4 = vpop.permute.xlu1 %843 }
  0xbb   : > { %v847_v2 = vsel %vm845_vm8, %v840_v60, %v842_v61  ;;  %v848_v6 = vsel %vm845_vm8, %v842_v61, %v844_v4 }
  0xbc   : > { %1315 = vmatmul.mubr.msk.bf16.vlgmr.msra.gmra.mrb[0].mxu0 %vm199_vm3, %v1313_v49  ;;  %1380 = vmatmul.mubr.msk.bf16.vlgmr.msra.gmra.mrb[0].mxu1 %vm199_vm3, %v1313_v49  ;;  %v859_v11 = vsel %vm203_vm2, %v848_v6, 0 }
  0xbd   : > { %642 = vmatpush1.bf16.msra.mxu0 %v633_v52  ;;  %1384 = vmatpush3.bf16.msra.mxu1 %v639_v53 }
  0xbe   : > { %673 = vmatprep.mubr.bf16.mxu0 %v1601_v1  ;;  %1385 = vmatprep.mubr.msk.bf16.mxu1 %vm1602_vm0, %v1600_v0  ;;  %v948_v3 = vpop.permute.xlu0 %947  ;;  %v950_v8 = vpop.permute.xlu1 %949 }
  0xbf   : > { %1322 = vmatprep.subr.msk.bf16.mxu0 %vm203_vm2, %v737_v54  ;;  %1389 = vmatprep.subr.bf16.mxu1 %v1600_v0  ;;  %v956_v15 = vsel %vm955_vm9, %v948_v3, %v950_v8 }
  0xc0   : > { %v963_v20 = vsel %vm203_vm2, %v956_v15, 0 }
  0xc2   : > { %v952_v9 = vpop.permute.xlu0 %951  ;;  %v954_v14 = vpop.permute.xlu1 %953 }
  0xc3   : > { %v957_v12 = vsel %vm955_vm9, %v950_v8, %v952_v9  ;;  %v958_v16 = vsel %vm955_vm9, %v952_v9, %v954_v14 }
  0xc4   : > { %v969_v21 = vsel %vm203_vm2, %v958_v16, 0 }
  0xc6   : > { %v1058_v13 = vpop.permute.xlu0 %1057  ;;  %v1060_v18 = vpop.permute.xlu1 %1059 }
  0xc7   : > { %v1066_v24 = vsel %vm1065_vm10, %v1058_v13, %v1060_v18 }
  0xc8   : > { %1319 = vmatmul.mubr.msk.bf16.vlgmr.msra.gmra.mrb[0].mxu0 %vm199_vm3, %v1317_v59  ;;  %1386 = vmatmul.mubr.msk.bf16.vlgmr.msra.gmra.mrb[0].mxu1 %vm199_vm3, %v1317_v59  ;;  %v1073_v27 = vsel %vm203_vm2, %v1066_v24, 0 }
  0xc9   : > { %752 = vmatpush1.bf16.msra.mxu0 %v743_v62  ;;  %1390 = vmatpush3.bf16.msra.mxu1 %v749_v63 }
  0xca   : > { %783 = vmatprep.mubr.bf16.mxu0 %v1601_v1  ;;  %1391 = vmatprep.mubr.msk.bf16.mxu1 %vm1602_vm0, %v1600_v0  ;;  %v1062_v19 = vpop.permute.xlu0 %1061  ;;  %v1064_v23 = vpop.permute.xlu1 %1063 }
  0xcb   : > { %1326 = vmatprep.subr.msk.bf16.mxu0 %vm203_vm2, %v847_v2  ;;  %1395 = vmatprep.subr.bf16.mxu1 %v1600_v0  ;;  %v1067_v22 = vsel %vm1065_vm10, %v1060_v18, %v1062_v19  ;;  %v1068_v25 = vsel %vm1065_vm10, %v1062_v19, %v1064_v23 }
  0xcc   : > { %v1079_v28 = vsel %vm203_vm2, %v1068_v25, 0 }
  0xd4   : > { %1323 = vmatmul.mubr.msk.bf16.vlgmr.msra.gmra.mrb[0].mxu0 %vm199_vm3, %v1321_v7  ;;  %1392 = vmatmul.mubr.msk.bf16.vlgmr.msra.gmra.mrb[0].mxu1 %vm199_vm3, %v1321_v7 }
  0xd5   : > { %862 = vmatpush1.bf16.msra.mxu0 %v853_v10  ;;  %1396 = vmatpush3.bf16.msra.mxu1 %v859_v11 }
  0xd6   : > { %893 = vmatprep.mubr.bf16.mxu0 %v1601_v1  ;;  %1397 = vmatprep.mubr.msk.bf16.mxu1 %vm1602_vm0, %v1600_v0 }
  0xd7   : > { %1330 = vmatprep.subr.msk.bf16.mxu0 %vm203_vm2, %v957_v12  ;;  %1401 = vmatprep.subr.bf16.mxu1 %v1600_v0 }
  0xe0   : > { %1327 = vmatmul.mubr.msk.bf16.vlgmr.msra.gmra.mrb[0].mxu0 %vm199_vm3, %v1325_v17  ;;  %1398 = vmatmul.mubr.msk.bf16.vlgmr.msra.gmra.mrb[0].mxu1 %vm199_vm3, %v1325_v17 }
  0xe1   : > { %972 = vmatpush1.bf16.msra.mxu0 %v963_v20  ;;  %1402 = vmatpush3.bf16.msra.mxu1 %v969_v21 }
  0xe2   : > { %1003 = vmatprep.mubr.bf16.mxu0 %v1601_v1  ;;  %1403 = vmatprep.mubr.msk.bf16.mxu1 %vm1602_vm0, %v1600_v0 }
  0xe3   : > { %1334 = vmatprep.subr.msk.bf16.mxu0 %vm203_vm2, %v1067_v22  ;;  %1407 = vmatprep.subr.bf16.mxu1 %v1600_v0 }
  0xec   : > { %1331 = vmatmul.mubr.msk.bf16.vlgmr.msra.gmra.mrb[0].mxu0 %vm199_vm3, %v1329_v26  ;;  %1404 = vmatmul.mubr.msk.bf16.vlgmr.msra.gmra.mrb[0].mxu1 %vm199_vm3, %v1329_v26 }
  0xed   : > { %1082 = vmatpush1.bf16.msra.mxu0 %v1073_v27  ;;  %1408 = vmatpush3.bf16.msra.mxu1 %v1079_v28 }
  0xee   : > { %1113 = vmatprep.mubr.bf16.mxu0 %v1601_v1  ;;  %1409 = vmatprep.mubr.msk.bf16.mxu1 %vm1602_vm0, %v1600_v0  ;;  %v1177_v1 = vsub.s32 2, %v1168_v31 }
  0xf0   : > { %v1178_v0 = vrot.slane %v1165_v33, %v1177_v1 }
  0xf8   : > { %1335 = vmatmul.mubr.msk.bf16.vlgmr.msra.gmra.mrb[0].mxu0 %vm199_vm3, %v1333_v29  ;;  %1410 = vmatmul.mubr.msk.bf16.vlgmr.msra.gmra.mrb[0].mxu1 %vm199_vm3, %v1333_v29 }
 0x1cb   : > { %v1115_v37 = vpop.f32.mrb[0].mxu0  ;;  %v1156_v38 = vpop.f32.mrb[0].mxu1 }
 0x1cc   : > { %v1182_v39 = vmul.f32 %v1170_v35, %v1115_v37  ;;  %v1117_v40 = vpop.f32.mrb[1].mxu0  ;;  %v1411_v41 = vpop.f32.mrb[1].mxu1  ;;  %v1184_v45 = vmul.f32 %v1178_v0, %v1156_v38 }
 0x1cd   : > { %v1183_v42 = vmul.f32 %v1174_v36, %v1117_v40  ;;  %v1119_v43 = vpop.f32.mrb[2].mxu0  ;;  %v1159_v44 = vpop.f32.mrb[2].mxu1 }
 0x1ce   : > { %v1189_v46 = vmul.f32 %v1182_v39, %v1115_v37  ;;  %v1120_v47 = vpop.f32.mrb[3].mxu0  ;;  %v1412_v48 = vpop.f32.mrb[3].mxu1  ;;  %v1191_v52 = vmul.f32 %v1184_v45, %v1156_v38 }
 0x1cf   : > { %v1190_v49 = vmul.f32 %v1183_v42, %v1117_v40  ;;  %v1185_v50 = vadd.f32 %v1183_v42, %v1182_v39 }
 0x1d1   : > { %v1186_v51 = vadd.f32 %v1185_v50, %v1184_v45  ;;  %v1192_v53 = vadd.f32 %v1190_v49, %v1189_v46 }
 0x1d3   : > { %1187 = vadd.xlane.f32.xlu0 %v1186_v51  ;;  %v1193_v54 = vadd.f32 %v1192_v53, %v1191_v52 }
 0x1d5   : > { %1194 = vadd.xlane.f32.xlu1 %v1193_v54 }
 0x260   : > { %v1188_v55 = vpop.xlane.xlu0 %1187 }
 0x261   : > { %v1196_v56 = vmul.f32 0.00390625, %v1188_v55 }
 0x262   : > { %v1195_v57 = vpop.xlane.xlu1 %1194 }
 0x263   : > { %v1197_v58 = vmul.f32 0.00390625, %v1195_v57  ;;  %v1198_v59 = vmul.f32 %v1196_v56, %v1196_v56  ;;  %v1201_v63 = vsub.f32 %v1115_v37, %v1196_v56  ;;  %v1202_v2 = vsub.f32 %v1117_v40, %v1196_v56 }
 0x264   : > { %v1203_v3 = vsub.f32 %v1156_v38, %v1196_v56 }
 0x265   : > { %v1199_v60 = vsub.f32 %v1197_v58, %v1198_v59 }
 0x267   : > { %v1200_v61 = vmax.f32 %v1199_v60, 0.0 }
 0x269   : > { %v1204_v62 = vadd.f32 1e-05, %v1200_v61 }
 0x26b   : > { %1534 = vrsqrt.f32 %v1204_v62 }
 0x275   : > { %v1535_v4 = vpop.eup %1534 }
 0x276   : > { %v1206_v5 = vmul.f32 %v1535_v4, %v1201_v63  ;;  %v1207_v6 = vmul.f32 %v1535_v4, %v1202_v2  ;;  %v1208_v7 = vmul.f32 %v1535_v4, %v1203_v3 }
 0x278   : > { %v1209_v8 = vmax.f32 %v1206_v5, 0.0  ;;  %v1210_v9 = vmax.f32 %v1207_v6, 0.0  ;;  %v1211_v10 = vmax.f32 %v1208_v7, 0.0 }
 0x27a   : > { %1212 = vst [vmem:[%s163_s24] sm:$0xff] %v1209_v8  ;;  %1213 = vst [vmem:[%s163_s24 + $0x8] sm:$0xff] %v1210_v9 }
 0x27b   : > { %1214 = vst [vmem:[%s163_s24 + $0x10] sm:$0xff] %v1211_v10 }
 0x27c   : > { %1549 = shalt.err (!%p1546_p3)
}
 0x27d   : > { %s1550_s6 = scalar_lea.hbm %s1824_s28, 384  ;;  %s1554_s9 = scalar_lea.hbm %s1869_s3, 768 }
 0x27e   : > { %p1551_p4 = scmp.ne.s32.totalorder %s1824_s28, %s1550_s6  ;;  %p1555_p9 = scmp.lt.u32.totalorder %s1824_s28, %s1869_s3 }
 0x27f   : > { %p1556_p10 = scmp.lt.u32.totalorder %s1554_s9, %s1550_s6  ;;  %p1558_p12 = scmp.lt.u32.totalorder %s1550_s6, %s1824_s28 }
 0x280   : > { %p1552_p7 = pnand %p1551_p4, %p1670_p5 }
 0x281   : > { %p1557_p11 = por %p1556_p10, %p1555_p9 }
 0x282   : > { %p1553_p8 = pneg %p1552_p7 }
 0x283   : > { %p1559_p13 = por %p1558_p12, %p1557_p11 }
 0x285   : > { %p1560_p0 = pnand %p1559_p13, %p1553_p8 }
 0x287   : > { %1563 = shalt.err (!%p1560_p0)
}
 0x288   : > { %1479 = dma.vmem_to_hbm [thread:$0]  (%p1670_p5), %s1826_s25, 384, %s1824_s28, %s1216_s16  }
 0x289 PF: > { %p1485_p1 = scmp.ge.s32.totalorder %s1598_s15, 2  ;;  %s1242_s17 = sand.u32 1, %s1586_s12  }
 0x28a   : > { %s1243_s19 = scalar_lea.sflag [#allocation3], %s1242_s17 }
 0x28b   : > { %p1482_p2 = pnand %p1485_p1, %p1674_p6 }
 0x28d   : > { %1581 = dma.done.wait (!%p1482_p2), %s1243_s19, 384  }
 0x28e   : > { %1583 = vsyncadd (!%p1482_p2), %s1243_s19, 4294966912  ;;  %p13_p3 = scmp.ge.s32.totalorder %s1657_s18, 4   ;;  %s1872_s12 = smov %s1590_s13 }
 0x28f   : > { %s1873_s13 = smov %s1594_s14  ;;  %s1874_s14 = smov %s1668_s21 }
 0x290   : > { %s1875_s15 = smov %s1657_s18  ;;  %15 = sbr.rel (!%p13_p3) target bundleno = 3 (0x3), region = 75 }
 0x297   :  { %1248 = vsyncpa [#allocation3], 1 }
 0x298   :  { %1250 = vsyncpa [#allocation3 + $0x1], 1 }

</bundles_post_ra>
